<compile_context>
chip_gen: v5e
topology: v5e:2x2
jax: 0.10.0
libtpu: 0.0.40
codegen_flags: <defaults>
</compile_context>

<pallas_src>
import functools

import jax
import jax.numpy as jnp
from jax.experimental import pallas as pl
from jax.experimental.pallas import tpu as pltpu

LANE = 128
EPS = 0.0  # GINConv default epsilon; compile-time 0 => (1+eps)*x == x


def _round_up(n, m):
    return ((n + m - 1) // m) * m


def _full_spec(shape):
    # Whole-array block, single grid point (grid-less call).
    return pl.BlockSpec(shape, lambda: (0,) * len(shape))


def _pad2(a, rows, cols):
    r, c = a.shape
    return jnp.pad(a, ((0, rows - r), (0, cols - c)))


def _pick_vmem_limit():
    """Per-generation scoped-VMEM budget.

    Raises v5e's 16 MiB scoped default; stays well inside v7x's 64 MiB
    physical VMEM (review: ~48 MiB on v7x, ~64 MiB on v5e/v6e).
    """
    try:
        cap = int(pltpu.get_tpu_info().vmem_capacity_bytes)
        if cap <= 0:
            cap = 64 * 1024 * 1024
    except Exception:
        cap = 64 * 1024 * 1024
    limit = min(int(cap * 3 // 4), 64 * 1024 * 1024)
    return max(limit, 32 * 1024 * 1024)


_VMEM_LIMIT = _pick_vmem_limit()


# ----------------------------------------------------------------------------
# Fused kernel: conv1 + relu + conv2 + relu + fc
# ----------------------------------------------------------------------------
def gin_fused_kernel(a_ref, x_ref,
                     w11_ref, b11_ref, w12_ref, b12_ref,
                     w21_ref, b21_ref, w22_ref, b22_ref,
                     wfc_ref, bfc_ref,
                     o_ref, *, reorder_l1):
    a = a_ref[...]        # bf16 [Np, Np], exact 0/1 adjacency (dst <- src)
    x = x_ref[...]        # bf16 [Np, Fp], lane-padded node features
    w11 = w11_ref[...]    # bf16 [Fp, 2Hp]
    b11 = b11_ref[...]    # f32  [1, 2Hp]

    if reorder_l1:
        # (x + A@x)@W1 + b1 == y + A@y + b1, y = x@W1  (exact for eps == 0).
        # The A-matmul contracts over 2H instead of F: far fewer MACs and a
        # much smaller bf16 cast at real Cora scale.
        y = jnp.dot(x, w11, preferred_element_type=jnp.float32)
        agg = jnp.dot(a, y.astype(jnp.bfloat16),
                      preferred_element_type=jnp.float32)
        h = y + agg + b11
    else:
        # Standard order (used when F_p < 2H_p).
        agg = jnp.dot(a, x, preferred_element_type=jnp.float32)
        h = x.astype(jnp.float32) + agg          # eps == 0 -> no (1+eps) mul
        h = jnp.dot(h.astype(jnp.bfloat16), w11,
                    preferred_element_type=jnp.float32) + b11
    h = jnp.maximum(h, 0.0)                                    # MLP hidden ReLU
    h = jnp.maximum(
        jnp.dot(h, w12_ref[...], preferred_element_type=jnp.float32)
        + b12_ref[...], 0.0)                                   # + trailing F.relu

    # ----- conv2 (H <= 2H: keep the standard aggregation order) -----
    agg = jnp.dot(a, h.astype(jnp.bfloat16),
                  preferred_element_type=jnp.float32)
    g = h + agg
    g = jnp.maximum(
        jnp.dot(g, w21_ref[...], preferred_element_type=jnp.float32)
        + b21_ref[...], 0.0)
    g = jnp.maximum(
        jnp.dot(g, w22_ref[...], preferred_element_type=jnp.float32)
        + b22_ref[...], 0.0)

    # ----- fc: lane-dense output slab (Cp = multiple of 128) -----
    o_ref[...] = (jnp.dot(g, wfc_ref[...], preferred_element_type=jnp.float32)
                  + bfc_ref[...])


# ----------------------------------------------------------------------------
# One-time parameter preparation (padding + casting OUT of the per-call path)
# ----------------------------------------------------------------------------
def prepare_params(params):
    f, h2 = params["w1_1"].shape
    h = params["w2_1"].shape[1]
    c = params["fc_w"].shape[1]
    fp, h2p, hp, cp = (_round_up(d, LANE) for d in (f, h2, h, c))

    return {
        # conv1 MLP (W1 shipped bf16: it feeds a bf16 x bf16 MXU matmul)
        "w11": _pad2(params["w1_1"], fp, h2p).astype(jnp.bfloat16),
        "b11": _pad2(params["b1_1"], 1, h2p),
        "w12": _pad2(params["w2_1"], h2p, hp),
        "b12": _pad2(params["b2_1"], 1, hp),
        # conv2 MLP
        "w21": _pad2(params["w1_2"], hp, h2p),
        "b21": _pad2(params["b1_2"], 1, h2p),
        "w22": _pad2(params["w2_2"], h2p, hp),
        "b22": _pad2(params["b2_2"], 1, hp),
        # fc
        "wfc": _pad2(params["fc_w"], hp, cp),
        "bfc": _pad2(params["fc_b"], 1, cp),
    }


# ----------------------------------------------------------------------------
# Jitted forward on padded data (only x / adj padded per call)
# ----------------------------------------------------------------------------
@jax.jit
def _gin_forward_padded(prepped, x, adj):
    n, _ = x.shape
    fp, h2p = prepped["w11"].shape
    cp = prepped["wfc"].shape[1]

    # Lane-align N so the adjacency is lane-dense on its contraction dim.
    np_ = _round_up(n, LANE)
    reorder_l1 = fp >= h2p  # static compile-time guard

    a_p = _pad2(adj, np_, np_).astype(jnp.bfloat16)   # 0/1 -> exact in bf16
    x_p = _pad2(x, np_, fp).astype(jnp.bfloat16)      # halves x's HBM DMA

    args = (
        a_p, x_p,
        prepped["w11"], prepped["b11"], prepped["w12"], prepped["b12"],
        prepped["w21"], prepped["b21"], prepped["w22"], prepped["b22"],
        prepped["wfc"], prepped["bfc"],
    )

    kernel = functools.partial(gin_fused_kernel, reorder_l1=reorder_l1)
    return pl.pallas_call(
        kernel,
        out_shape=jax.ShapeDtypeStruct((np_, cp), jnp.float32),
        in_specs=[_full_spec(arr.shape) for arr in args],
        out_specs=_full_spec((np_, cp)),
        compiler_params=pltpu.CompilerParams(vmem_limit_bytes=_VMEM_LIMIT),
    )(*args)


def gin_classifier_forward(prepped, x, adj, num_classes):
    # Padded rows/cols hold relu(bias)-propagated garbage by construction;
    # they MUST be sliced off (never consume the padded slab directly).
    logits_padded = _gin_forward_padded(prepped, x, adj)
    return logits_padded[: x.shape[0], :num_classes]


# ----------------------------------------------------------------------------
# References
# ----------------------------------------------------------------------------
def reference_forward_f32(params, x, adj):
    """Pure-f32 PyTorch-semantics reference (standard aggregation order)."""
    def layer(h_in, w1, b1, w2, b2):
        agg = adj @ h_in
        h = (1.0 + EPS) * h_in + agg
        h = jnp.maximum(h @ w1 + b1, 0.0)
        h = jnp.maximum(h @ w2 + b2, 0.0)
        return h

    h = layer(x, params["w1_1"], params["b1_1"], params["w2_1"], params["b2_1"])
    h = layer(h, params["w1_2"], params["b1_2"], params["w2_2"], params["b2_2"])
    return h @ params["fc_w"] + params["fc_b"]


def reference_forward_mirrored(params, x, adj, reorder_l1):
    """Pure-JAX reference mirroring the kernel's bf16 casts / op order."""
    a = adj.astype(jnp.bfloat16)
    xb = x.astype(jnp.bfloat16)
    w11 = params["w1_1"].astype(jnp.bfloat16)

    if reorder_l1:
        y = jnp.dot(xb, w11, preferred_element_type=jnp.float32)
        agg = jnp.dot(a, y.astype(jnp.bfloat16),
                      preferred_element_type=jnp.float32)
        h = y + agg + params["b1_1"]
    else:
        agg = jnp.dot(a, xb, preferred_element_type=jnp.float32)
        h = xb.astype(jnp.float32) + agg
        h = jnp.dot(h.astype(jnp.bfloat16), w11,
                    preferred_element_type=jnp.float32) + params["b1_1"]
    h = jnp.maximum(h, 0.0)
    h = jnp.maximum(h @ params["w2_1"] + params["b2_1"], 0.0)

    agg = jnp.dot(a, h.astype(jnp.bfloat16),
                  preferred_element_type=jnp.float32)
    g = h + agg
    g = jnp.maximum(g @ params["w1_2"] + params["b1_2"], 0.0)
    g = jnp.maximum(g @ params["w2_2"] + params["b2_2"], 0.0)
    return g @ params["fc_w"] + params["fc_b"]


# ----------------------------------------------------------------------------
# Main
# ----------------------------------------------------------------------------
if __name__ == "__main__":
    # Small synthetic "Cora-like" problem.
    num_nodes = 128
    in_channels = 32
    hidden_channels = 16
    num_classes = 8

    key = jax.random.PRNGKey(0)
    keys = jax.random.split(key, 10)

    # Node features.
    x = jax.random.normal(keys[0], (num_nodes, in_channels), dtype=jnp.float32)

    # Deterministic edge_index: bidirectional ring graph [2, 2N].
    src = jnp.arange(num_nodes, dtype=jnp.int32)
    dst = (src + 1) % num_nodes
    edge_index = jnp.stack(
        [jnp.concatenate([src, dst]), jnp.concatenate([dst, src])], axis=0
    )
    # Dense adjacency for sum-aggregation at the destination node.
    adj = jnp.zeros((num_nodes, num_nodes), dtype=jnp.float32)
    adj = adj.at[edge_index[1], edge_index[0]].set(1.0)

    # Deterministic parameter init (synthetic weights, no checkpoint).
    def init(k, shape, fan_in):
        return jax.random.normal(k, shape, dtype=jnp.float32) / jnp.sqrt(fan_in)

    params = {
        # conv1 MLP: [in, 2H, H]
        "w1_1": init(keys[1], (in_channels, 2 * hidden_channels), in_channels),
        "b1_1": jnp.zeros((1, 2 * hidden_channels), jnp.float32),
        "w2_1": init(keys[2], (2 * hidden_channels, hidden_channels),
                     2 * hidden_channels),
        "b2_1": jnp.zeros((1, hidden_channels), jnp.float32),
        # conv2 MLP: [H, 2H, H]
        "w1_2": init(keys[3], (hidden_channels, 2 * hidden_channels),
                     hidden_channels),
        "b1_2": jnp.zeros((1, 2 * hidden_channels), jnp.float32),
        "w2_2": init(keys[4], (2 * hidden_channels, hidden_channels),
                     2 * hidden_channels),
        "b2_2": jnp.zeros((1, hidden_channels), jnp.float32),
        # fc
        "fc_w": init(keys[5], (hidden_channels, num_classes), hidden_channels),
        "fc_b": jnp.zeros((1, num_classes), jnp.float32),
    }

    # One-time parameter prep (padding / casting amortized across calls).
    prepped = jax.tree_util.tree_map(jax.block_until_ready,
                                     prepare_params(params))

    logits = jax.block_until_ready(
        gin_classifier_forward(prepped, x, adj, num_classes))
    assert logits.shape == (num_nodes, num_classes)

    # Static guard used by the kernel at these shapes (F_p >= 2H_p here).
    reorder_l1 = (_round_up(in_channels, LANE)
                  >= _round_up(2 * hidden_channels, LANE))

    # Tight check vs. a reference mirroring the kernel's bf16 casts / op order.
    ref_bf16 = reference_forward_mirrored(params, x, adj, reorder_l1)
    assert jnp.allclose(logits, ref_bf16, atol=2e-2, rtol=2e-2)

    # Looser check vs. the pure-f32 PyTorch-semantics reference (only source of
    # difference is where bf16 casts land around the aggregation matmuls).
    ref_f32 = reference_forward_f32(params, x, adj)
    assert jnp.allclose(logits, ref_f32, atol=2e-1, rtol=2e-1)

    print("KERNEL_OK")
</pallas_src>

<mosaic_0001>
module attributes {stable_mosaic.version = 11 : i64} {
  func.func @gin_fused_kernel(%arg0: memref<128x128xbf16, #tpu.memory_space<vmem>>, %arg1: memref<128x128xbf16, #tpu.memory_space<vmem>>, %arg2: memref<128x128xbf16, #tpu.memory_space<vmem>>, %arg3: memref<1x128xf32, #tpu.memory_space<vmem>>, %arg4: memref<128x128xf32, #tpu.memory_space<vmem>>, %arg5: memref<1x128xf32, #tpu.memory_space<vmem>>, %arg6: memref<128x128xf32, #tpu.memory_space<vmem>>, %arg7: memref<1x128xf32, #tpu.memory_space<vmem>>, %arg8: memref<128x128xf32, #tpu.memory_space<vmem>>, %arg9: memref<1x128xf32, #tpu.memory_space<vmem>>, %arg10: memref<128x128xf32, #tpu.memory_space<vmem>>, %arg11: memref<1x128xf32, #tpu.memory_space<vmem>>, %arg12: memref<128x128xf32, #tpu.memory_space<vmem>>) attributes {dimension_semantics = [], scalar_prefetch = 0 : i64, scratch_operands = 0 : i64, tpu.core_type = #tpu.core_type<tc>} {
    %c0 = arith.constant 0 : index
    %c0_0 = arith.constant 0 : index
    %0 = vector.load %arg0[%c0, %c0_0] : memref<128x128xbf16, #tpu.memory_space<vmem>>, vector<128x128xbf16>
    %c0_1 = arith.constant 0 : index
    %c0_2 = arith.constant 0 : index
    %1 = vector.load %arg1[%c0_1, %c0_2] : memref<128x128xbf16, #tpu.memory_space<vmem>>, vector<128x128xbf16>
    %c0_3 = arith.constant 0 : index
    %c0_4 = arith.constant 0 : index
    %2 = vector.load %arg2[%c0_3, %c0_4] : memref<128x128xbf16, #tpu.memory_space<vmem>>, vector<128x128xbf16>
    %c0_5 = arith.constant 0 : index
    %c0_6 = arith.constant 0 : index
    %3 = vector.load %arg3[%c0_5, %c0_6] : memref<1x128xf32, #tpu.memory_space<vmem>>, vector<1x128xf32>
    %cst = arith.constant dense<0.000000e+00> : vector<128x128xf32>
    %4 = tpu.matmul %1, %2, %cst {dimension_numbers = #tpu.dot_dimension_numbers<[1], [0], [0], [1], [0, 0, 1, 1], [], []>} : vector<128x128xbf16>, vector<128x128xbf16>, vector<128x128xf32> -> vector<128x128xf32>
    %5 = arith.truncf %4 : vector<128x128xf32> to vector<128x128xbf16>
    %cst_7 = arith.constant dense<0.000000e+00> : vector<128x128xf32>
    %6 = tpu.matmul %0, %5, %cst_7 {dimension_numbers = #tpu.dot_dimension_numbers<[1], [0], [0], [1], [0, 0, 1, 1], [], []>} : vector<128x128xbf16>, vector<128x128xbf16>, vector<128x128xf32> -> vector<128x128xf32>
    %7 = arith.addf %4, %6 : vector<128x128xf32>
    %8 = vector.broadcast %3 : vector<1x128xf32> to vector<128x128xf32>
    %9 = arith.addf %7, %8 : vector<128x128xf32>
    %cst_8 = arith.constant 0.000000e+00 : f32
    %10 = vector.broadcast %cst_8 : f32 to vector<128x128xf32>
    %11 = arith.maximumf %9, %10 : vector<128x128xf32>
    %c0_9 = arith.constant 0 : index
    %c0_10 = arith.constant 0 : index
    %12 = vector.load %arg4[%c0_9, %c0_10] : memref<128x128xf32, #tpu.memory_space<vmem>>, vector<128x128xf32>
    %cst_11 = arith.constant dense<0.000000e+00> : vector<128x128xf32>
    %13 = tpu.matmul %11, %12, %cst_11 {dimension_numbers = #tpu.dot_dimension_numbers<[1], [0], [0], [1], [0, 0, 1, 1], [], []>} : vector<128x128xf32>, vector<128x128xf32>, vector<128x128xf32> -> vector<128x128xf32>
    %c0_12 = arith.constant 0 : index
    %c0_13 = arith.constant 0 : index
    %14 = vector.load %arg5[%c0_12, %c0_13] : memref<1x128xf32, #tpu.memory_space<vmem>>, vector<1x128xf32>
    %15 = vector.broadcast %14 : vector<1x128xf32> to vector<128x128xf32>
    %16 = arith.addf %13, %15 : vector<128x128xf32>
    %cst_14 = arith.constant 0.000000e+00 : f32
    %17 = vector.broadcast %cst_14 : f32 to vector<128x128xf32>
    %18 = arith.maximumf %16, %17 : vector<128x128xf32>
    %19 = arith.truncf %18 : vector<128x128xf32> to vector<128x128xbf16>
    %cst_15 = arith.constant dense<0.000000e+00> : vector<128x128xf32>
    %20 = tpu.matmul %0, %19, %cst_15 {dimension_numbers = #tpu.dot_dimension_numbers<[1], [0], [0], [1], [0, 0, 1, 1], [], []>} : vector<128x128xbf16>, vector<128x128xbf16>, vector<128x128xf32> -> vector<128x128xf32>
    %21 = arith.addf %18, %20 : vector<128x128xf32>
    %c0_16 = arith.constant 0 : index
    %c0_17 = arith.constant 0 : index
    %22 = vector.load %arg6[%c0_16, %c0_17] : memref<128x128xf32, #tpu.memory_space<vmem>>, vector<128x128xf32>
    %cst_18 = arith.constant dense<0.000000e+00> : vector<128x128xf32>
    %23 = tpu.matmul %21, %22, %cst_18 {dimension_numbers = #tpu.dot_dimension_numbers<[1], [0], [0], [1], [0, 0, 1, 1], [], []>} : vector<128x128xf32>, vector<128x128xf32>, vector<128x128xf32> -> vector<128x128xf32>
    %c0_19 = arith.constant 0 : index
    %c0_20 = arith.constant 0 : index
    %24 = vector.load %arg7[%c0_19, %c0_20] : memref<1x128xf32, #tpu.memory_space<vmem>>, vector<1x128xf32>
    %25 = vector.broadcast %24 : vector<1x128xf32> to vector<128x128xf32>
    %26 = arith.addf %23, %25 : vector<128x128xf32>
    %cst_21 = arith.constant 0.000000e+00 : f32
    %27 = vector.broadcast %cst_21 : f32 to vector<128x128xf32>
    %28 = arith.maximumf %26, %27 : vector<128x128xf32>
    %c0_22 = arith.constant 0 : index
    %c0_23 = arith.constant 0 : index
    %29 = vector.load %arg8[%c0_22, %c0_23] : memref<128x128xf32, #tpu.memory_space<vmem>>, vector<128x128xf32>
    %cst_24 = arith.constant dense<0.000000e+00> : vector<128x128xf32>
    %30 = tpu.matmul %28, %29, %cst_24 {dimension_numbers = #tpu.dot_dimension_numbers<[1], [0], [0], [1], [0, 0, 1, 1], [], []>} : vector<128x128xf32>, vector<128x128xf32>, vector<128x128xf32> -> vector<128x128xf32>
    %c0_25 = arith.constant 0 : index
    %c0_26 = arith.constant 0 : index
    %31 = vector.load %arg9[%c0_25, %c0_26] : memref<1x128xf32, #tpu.memory_space<vmem>>, vector<1x128xf32>
    %32 = vector.broadcast %31 : vector<1x128xf32> to vector<128x128xf32>
    %33 = arith.addf %30, %32 : vector<128x128xf32>
    %cst_27 = arith.constant 0.000000e+00 : f32
    %34 = vector.broadcast %cst_27 : f32 to vector<128x128xf32>
    %35 = arith.maximumf %33, %34 : vector<128x128xf32>
    %c0_28 = arith.constant 0 : index
    %c0_29 = arith.constant 0 : index
    %36 = vector.load %arg10[%c0_28, %c0_29] : memref<128x128xf32, #tpu.memory_space<vmem>>, vector<128x128xf32>
    %cst_30 = arith.constant dense<0.000000e+00> : vector<128x128xf32>
    %37 = tpu.matmul %35, %36, %cst_30 {dimension_numbers = #tpu.dot_dimension_numbers<[1], [0], [0], [1], [0, 0, 1, 1], [], []>} : vector<128x128xf32>, vector<128x128xf32>, vector<128x128xf32> -> vector<128x128xf32>
    %c0_31 = arith.constant 0 : index
    %c0_32 = arith.constant 0 : index
    %38 = vector.load %arg11[%c0_31, %c0_32] : memref<1x128xf32, #tpu.memory_space<vmem>>, vector<1x128xf32>
    %39 = vector.broadcast %38 : vector<1x128xf32> to vector<128x128xf32>
    %40 = arith.addf %37, %39 : vector<128x128xf32>
    %c0_33 = arith.constant 0 : index
    %c0_34 = arith.constant 0 : index
    %41 = vector.load %arg12[%c0_33, %c0_34] : memref<128x128xf32, #tpu.memory_space<vmem>>, vector<128x128xf32>
    tpu.vector_store %arg12[%c0_33, %c0_34], %40 {strides = array<i32>} : memref<128x128xf32, #tpu.memory_space<vmem>>, vector<128x128xf32>,
    return
  }
}

</mosaic_0001>

<bundles_post_ra>
// kernel: _gin_forward_padded.1
= control target key start
LH: loop header
LB: loop body
LE: loop exit
PB: predicated region body
PF: predicated region fallthrough
CT: control target
= control target key end

     0   :  { %17 = vsyncpa [#allocation3], 0  ;;  %s1815_s0 = inlined_call_operand.vmem [shape: bf16[128,128], index: 0, kind: input, shape index: {}]   ;;  %s1816_s1 = inlined_call_operand.vmem [shape: bf16[128,128], index: 1, kind: input, shape index: {}]   ;;  %s1817_s2 = inlined_call_operand.vmem [shape: bf16[128,128], index: 2, kind: input, shape index: {}]   ;;  %s1818_s3 = inlined_call_operand.vmem [shape: f32[1,128], index: 3, kind: input, shape index: {}]   ;;  %s1819_s4 = inlined_call_operand.vmem [shape: f32[128,128], index: 4, kind: input, shape index: {}]   ;;  %s1820_s5 = inlined_call_operand.hbm [shape: f32[1,128], index: 5, kind: input, shape index: {}]   ;;  %s1821_s6 = inlined_call_operand.vmem [shape: f32[128,128], index: 6, kind: input, shape index: {}]   ;;  %s1822_s7 = inlined_call_operand.hbm [shape: f32[1,128], index: 7, kind: input, shape index: {}]   ;;  %s1823_s8 = inlined_call_operand.hbm [shape: f32[128,128], index: 8, kind: input, shape index: {}]   ;;  %s1824_s9 = inlined_call_operand.hbm [shape: f32[1,128], index: 9, kind: input, shape index: {}]   ;;  %s1825_s10 = inlined_call_operand.hbm [shape: f32[128,128], index: 10, kind: input, shape index: {}]   ;;  %s1826_s11 = inlined_call_operand.hbm [shape: f32[1,128], index: 11, kind: input, shape index: {}]   ;;  %s1827_s12 = inlined_call_operand.hbm [shape: f32[128,128], index: 12, kind: output, shape index: {}]  }
   0x1   :  { %18 = vsyncpa [#allocation6], 0 }
   0x2   :  { %19 = vsyncpa [#allocation9], 0 }
   0x3   :  { %20 = vsyncpa [#allocation12], 0  ;;  %s50_s23 = sshll.u32 %s1822_s7, 4  ;;  %s51_s23 = int_to_ptr.hbm [resolvable:$true] %s50_s23 }
   0x4   :  { %21 = vsyncpa [#allocation4], 0  ;;  %s1321_s24 = smov [#allocation5]   ;;  %s74_s28 = sshll.u32 %s1824_s9, 4  ;;  %s75_s28 = int_to_ptr.hbm [resolvable:$true] %s74_s28 }
   0x5   :  { %s52_s25 = sshll.u32 %s1321_s24, 4  ;;  %s1322_s29 = smov [#allocation8]   ;;  %s53_s25 = int_to_ptr.vmem [resolvable:$true] %s52_s25 }
   0x6   :  { %55 = dma.hbm_to_vmem [thread:$0]  %s51_s23, 16, %s53_s25, [#allocation6]  }
   0x7   :  { %s76_s30 = sshll.u32 %s1322_s29, 4  ;;  %s37_s15 = sshll.u32 %s1820_s5, 4  ;;  %s77_s30 = int_to_ptr.vmem [resolvable:$true] %s76_s30  ;;  %s38_s15 = int_to_ptr.hbm [resolvable:$true] %s37_s15 }
   0x8   :  { %79 = dma.hbm_to_vmem [thread:$0]  %s75_s28, 16, %s77_s30, [#allocation9]  }
   0x9   :  { %s60_s17 = sshll.u32 %s1823_s8, 4  ;;  %s1323_s18 = smov [#allocation2]   ;;  %s61_s17 = int_to_ptr.hbm [resolvable:$true] %s60_s17 }
   0xa   :  { %s39_s19 = sshll.u32 %s1323_s18, 4  ;;  %s1324_s9 = smov [#allocation7]   ;;  %s40_s19 = int_to_ptr.vmem [resolvable:$true] %s39_s19 }
   0xb   :  { %42 = dma.hbm_to_vmem [thread:$0]  %s38_s15, 16, %s40_s19, [#allocation3]  }
   0xc   :  { %s62_s20 = sshll.u32 %s1324_s9, 4  ;;  %s1325_s21 = smov 128   ;;  %s63_s20 = int_to_ptr.vmem [resolvable:$true] %s62_s20 }
   0xd   :  { %s1326_s22 = smov 8   ;;  %s84_s24 = sshll.u32 %s1825_s10, 4  ;;  %s85_s24 = int_to_ptr.hbm [resolvable:$true] %s84_s24 }
   0xe   :  { %68 = dma.hbm_to_vmem [thread:$0]  %s61_s17, 2048, %s63_s20, [#allocation6], %s1325_s21, %s1325_s21, %s1326_s22  }
   0xf   :  { %s1327_s8 = smov [#allocation10]   ;;  %s98_s28 = sshll.u32 %s1826_s11, 4  ;;  %s99_s28 = int_to_ptr.hbm [resolvable:$true] %s98_s28 }
  0x10   :  { %s86_s25 = sshll.u32 %s1327_s8, 4  ;;  %s1328_s29 = smov [#allocation11]   ;;  %s87_s25 = int_to_ptr.vmem [resolvable:$true] %s86_s25 }
  0x11   :  { %92 = dma.hbm_to_vmem [thread:$0]  %s85_s24, 2048, %s87_s25, [#allocation9], %s1325_s21, %s1325_s21, %s1326_s22  }
  0x12   :  { %s100_s30 = sshll.u32 %s1328_s29, 4  ;;  %s101_s30 = int_to_ptr.vmem [resolvable:$true] %s100_s30 }
  0x13   :  { %103 = dma.hbm_to_vmem [thread:$0]  %s99_s28, 16, %s101_s30, [#allocation12]  }
  0x14   :  { %1311 = dma.done.wait [#allocation3], 16  }
  0x15   :  { %1312 = vsyncadd [#allocation3], 4294967280 }
  0x16   :  { %1313 = dma.done.wait [#allocation6], 2064  }
  0x17   :  { %1314 = vsyncadd [#allocation6], 4294965232 }
  0x18   :  { %1315 = dma.done.wait [#allocation9], 2064  }
  0x19   :  { %1316 = vsyncadd [#allocation9], 4294965232 }
  0x1a   :  { %1317 = dma.done.wait [#allocation12], 16  }
  0x1b   :  { %1318 = vsyncadd [#allocation12], 4294967280  ;;  %v1096_v0 = vld [vmem:[%s1817_s2 + $0x38] sm:$0xff]  ;;  %v1095_v1 = vld [vmem:[%s1817_s2 + $0x30] sm:$0xff]  ;;  %s961_s8 = sshll.u32 %s1827_s12, 4  ;;  %s962_s8 = int_to_ptr.hbm [resolvable:$true] %s961_s8 }
  0x1c   :  { %1097 = vmatpush.bf16.msra.mxu3 %v1096_v0  ;;  %273 = vmatpush.bf16.msra.mxu0 %v1096_v0  ;;  %v1094_v2 = vld [vmem:[%s1817_s2 + $0x28] sm:$0xff]  ;;  %v1093_v3 = vld [vmem:[%s1817_s2 + $0x20] sm:$0xff]  ;;  %v1092_v4 = vld [vmem:[%s1817_s2 + $0x18] sm:$0xff] }
  0x1d   :  { %v1091_v5 = vld [vmem:[%s1817_s2 + $0x10] sm:$0xff]  ;;  %v1090_v6 = vld [vmem:[%s1817_s2 + $0x8] sm:$0xff]  ;;  %v1089_v7 = vld [vmem:[%s1817_s2] sm:$0xff] }
  0x1e   :  { %v1083_v8 = vld [vmem:[%s1816_s1 + $0x10] sm:$0xff]  ;;  %v1084_v9 = vld [vmem:[%s1816_s1 + $0x18] sm:$0xff]  ;;  %v1085_v10 = vld [vmem:[%s1816_s1 + $0x20] sm:$0xff] }
  0x1f   :  { %v1086_v11 = vld [vmem:[%s1816_s1 + $0x28] sm:$0xff]  ;;  %v1081_v12 = vld [vmem:[%s1816_s1] sm:$0xff]  ;;  %v1087_v13 = vld [vmem:[%s1816_s1 + $0x30] sm:$0xff] }
  0x20   :  { %1098 = vmatpush.bf16.msra.mxu3 %v1095_v1  ;;  %274 = vmatpush.bf16.msra.mxu0 %v1095_v1  ;;  %v1082_v14 = vld [vmem:[%s1816_s1 + $0x8] sm:$0xff]  ;;  %v1088_v15 = vld [vmem:[%s1816_s1 + $0x38] sm:$0xff]  ;;  %v1518_v40 = vld [vmem:[%s1815_s0] sm:$0xff] }
  0x21   :  { %v1523_v41 = vld [vmem:[%s1815_s0 + $0x10] sm:$0xff]  ;;  %v1530_v42 = vld [vmem:[%s1815_s0 + $0x8] sm:$0xff]  ;;  %v1535_v43 = vld [vmem:[%s1815_s0 + $0x18] sm:$0xff] }
  0x22   :  { %v1542_v44 = vld [vmem:[%s1815_s0 + $0x20] sm:$0xff]  ;;  %v1548_v45 = vld [vmem:[%s1815_s0 + $0x28] sm:$0xff]  ;;  %v493_v46 = vld [vmem:[%s1819_s4 + $0x78] sm:$0xff] }
  0x23   :  { %v492_v47 = vld [vmem:[%s1819_s4 + $0x70] sm:$0xff]  ;;  %1113 = vmatpush.msra.mxu2 %v493_v46  ;;  %v491_v48 = vld [vmem:[%s1819_s4 + $0x68] sm:$0xff]  ;;  %v490_v49 = vld [vmem:[%s1819_s4 + $0x60] sm:$0xff] }
  0x24   :  { %1099 = vmatpush.bf16.msra.mxu3 %v1094_v2  ;;  %275 = vmatpush.bf16.msra.mxu0 %v1094_v2  ;;  %v489_v50 = vld [vmem:[%s1819_s4 + $0x58] sm:$0xff]  ;;  %v488_v51 = vld [vmem:[%s1819_s4 + $0x50] sm:$0xff]  ;;  %v487_v52 = vld [vmem:[%s1819_s4 + $0x48] sm:$0xff] }
  0x25   :  { %1114 = vmatpush.msra.mxu2 %v492_v47  ;;  %v1575_v53 = vld [vmem:[%s1815_s0 + $0x30] sm:$0xff]  ;;  %v486_v54 = vld [vmem:[%s1819_s4 + $0x40] sm:$0xff]  ;;  %v485_v55 = vld [vmem:[%s1819_s4 + $0x38] sm:$0xff] }
  0x26   :  { %v484_v56 = vld [vmem:[%s1819_s4 + $0x30] sm:$0xff]  ;;  %v483_v57 = vld [vmem:[%s1819_s4 + $0x28] sm:$0xff]  ;;  %v482_v58 = vld [vmem:[%s1819_s4 + $0x20] sm:$0xff] }
  0x27   :  { %1115 = vmatpush.msra.mxu2 %v491_v48  ;;  %v1596_v59 = vld [vmem:[%s1815_s0 + $0x38] sm:$0xff]  ;;  %v480_v61 = vld [vmem:[%s1819_s4 + $0x10] sm:$0xff]  ;;  %v479_v62 = vld [vmem:[%s1819_s4 + $0x8] sm:$0xff] }
  0x28   :  { %1100 = vmatpush.bf16.msra.mxu3 %v1093_v3  ;;  %276 = vmatpush.bf16.msra.mxu0 %v1093_v3  ;;  %v481_v60 = vld [vmem:[%s1819_s4 + $0x18] sm:$0xff]  ;;  %v478_v63 = vld [vmem:[%s1819_s4] sm:$0xff] }
  0x29   :  { %1116 = vmatpush.msra.mxu2 %v490_v49  ;;  %v1614_v0 = vld [vmem:[%s1818_s3] ss:$0 sm:$0xff] }
  0x2b   :  { %1117 = vmatpush.msra.mxu2 %v489_v50 }
  0x2c   :  { %1101 = vmatpush.bf16.msra.mxu3 %v1092_v4  ;;  %277 = vmatpush.bf16.msra.mxu0 %v1092_v4 }
  0x2d   :  { %1118 = vmatpush.msra.mxu2 %v488_v51 }
  0x2f   :  { %1119 = vmatpush.msra.mxu2 %v487_v52 }
  0x30   :  { %1102 = vmatpush.bf16.msra.mxu3 %v1091_v5  ;;  %278 = vmatpush.bf16.msra.mxu0 %v1091_v5 }
  0x31   :  { %1120 = vmatpush.msra.mxu2 %v486_v54 }
  0x33   :  { %1121 = vmatpush.msra.mxu2 %v485_v55 }
  0x34   :  { %1103 = vmatpush.bf16.msra.mxu3 %v1090_v6  ;;  %279 = vmatpush.bf16.msra.mxu0 %v1090_v6 }
  0x35   :  { %1122 = vmatpush.msra.mxu2 %v484_v56 }
  0x37   :  { %1123 = vmatpush.msra.mxu2 %v483_v57 }
  0x38   :  { %1104 = vmatpush.bf16.msra.mxu3 %v1089_v7  ;;  %280 = vmatpush.bf16.msra.mxu0 %v1089_v7 }
  0x39   :  { %1124 = vmatpush.msra.mxu2 %v482_v58 }
  0x3b   :  { %291 = vmatmul.bf16.vlgmr.msra.gmra.mxu3 %v1083_v8  ;;  %281 = vmatmul.bf16.vlgmr.msra.gmra.mxu0 %v1081_v12 }
  0x3c   :  { %1125 = vmatpush.msra.mxu2 %v481_v60 }
  0x3e   :  { %1126 = vmatpush.msra.mxu2 %v480_v61 }
  0x40   :  { %1127 = vmatpush.msra.mxu2 %v479_v62 }
  0x42   :  { %1128 = vmatpush.msra.mxu2 %v478_v63 }
  0x4b   :  { %296 = vmatmul.bf16.gmra.mxu3 %v1084_v9  ;;  %286 = vmatmul.bf16.gmra.mxu0 %v1082_v14 }
  0x5b   :  { %301 = vmatmul.bf16.gmra.mxu3 %v1085_v10 }
  0x6b   :  { %306 = vmatmul.bf16.gmra.mxu3 %v1086_v11 }
  0x7b   :  { %311 = vmatmul.bf16.gmra.mxu3 %v1087_v13 }
  0x8b   :  { %316 = vmatmul.bf16.gmra.mxu3 %v1088_v15 }
  0xb8   :  { %v1487_v26 = vpop.f32.mrf.mxu0 }
  0xbe   :  { %v1467_v16 = vpop.f32.mrf.mxu3 }
  0xc0   :  { %v1495_v30 = vpop.f32.mrf.mxu0 }
  0xc1   :  { %v322_v39 = vpack.c.bf16 %v1495_v30, %v1487_v26 }
  0xc6   :  { %v1469_v17 = vpop.f32.mrf.mxu3 }
  0xc7   :  { %v324_v36 = vpack.c.bf16 %v1469_v17, %v1467_v16 }
  0xc8   :  { %v1501_v33 = vpop.f32.mrf.mxu0 }
  0xce   :  { %v1471_v18 = vpop.f32.mrf.mxu3 }
  0xd0   :  { %v1509_v37 = vpop.f32.mrf.mxu0 }
  0xd1   :  { %v323_v38 = vpack.c.bf16 %v1509_v37, %v1501_v33 }
  0xd6   :  { %v1473_v19 = vpop.f32.mrf.mxu3 }
  0xd7   :  { %v325_v35 = vpack.c.bf16 %v1473_v19, %v1471_v18 }
  0xde   :  { %v1475_v20 = vpop.f32.mrf.mxu3 }
  0xe6   :  { %v1477_v21 = vpop.f32.mrf.mxu3 }
  0xe7   :  { %v326_v34 = vpack.c.bf16 %v1477_v21, %v1475_v20 }
  0xee   :  { %v1479_v22 = vpop.f32.mrf.mxu3 }
  0xf6   :  { %v1481_v23 = vpop.f32.mrf.mxu3 }
  0xf7   :  { %v327_v32 = vpack.c.bf16 %v1481_v23, %v1479_v22 }
  0xfe   :  { %v1483_v24 = vpop.f32.mrf.mxu3 }
 0x106   :  { %v1485_v25 = vpop.f32.mrf.mxu3 }
 0x107   :  { %v328_v31 = vpack.c.bf16 %v1485_v25, %v1483_v24 }
 0x10e   :  { %v1489_v27 = vpop.f32.mrf.mxu3 }
 0x116   :  { %v1491_v28 = vpop.f32.mrf.mxu3 }
 0x117   :  { %v329_v29 = vpack.c.bf16 %v1491_v28, %v1489_v27 }
 0x119   :  { %378 = vmatpush.bf16.msrb.mxu0 %v329_v29  ;;  %1105 = vmatpush.bf16.msra.mxu1 %v329_v29 }
 0x11d   :  { %379 = vmatpush.bf16.msrb.mxu0 %v328_v31  ;;  %1106 = vmatpush.bf16.msra.mxu1 %v328_v31 }
 0x121   :  { %380 = vmatpush.bf16.msrb.mxu0 %v327_v32  ;;  %1107 = vmatpush.bf16.msra.mxu1 %v327_v32 }
 0x125   :  { %381 = vmatpush.bf16.msrb.mxu0 %v326_v34  ;;  %1108 = vmatpush.bf16.msra.mxu1 %v326_v34 }
 0x129   :  { %382 = vmatpush.bf16.msrb.mxu0 %v325_v35  ;;  %1109 = vmatpush.bf16.msra.mxu1 %v325_v35 }
 0x12d   :  { %383 = vmatpush.bf16.msrb.mxu0 %v324_v36  ;;  %1110 = vmatpush.bf16.msra.mxu1 %v324_v36 }
 0x131   :  { %384 = vmatpush.bf16.msrb.mxu0 %v323_v38  ;;  %1111 = vmatpush.bf16.msra.mxu1 %v323_v38 }
 0x135   :  { %385 = vmatpush.bf16.msrb.mxu0 %v322_v39  ;;  %1112 = vmatpush.bf16.msra.mxu1 %v322_v39 }
 0x138   :  { %386 = vmatmul.bf16.vlgmr.msrb.gmra.mxu0 %v1518_v40  ;;  %396 = vmatmul.bf16.vlgmr.msra.gmra.mxu1 %v1523_v41 }
 0x139   :  { %498 = vmatpush.msra.mxu0 %v493_v46 }
 0x13b   :  { %499 = vmatpush.msra.mxu0 %v492_v47 }
 0x13d   :  { %500 = vmatpush.msra.mxu0 %v491_v48 }
 0x13f   :  { %501 = vmatpush.msra.mxu0 %v490_v49 }
 0x141   :  { %502 = vmatpush.msra.mxu0 %v489_v50 }
 0x143   :  { %503 = vmatpush.msra.mxu0 %v488_v51 }
 0x145   :  { %504 = vmatpush.msra.mxu0 %v487_v52 }
 0x147   :  { %505 = vmatpush.msra.mxu0 %v486_v54 }
 0x148   :  { %391 = vmatmul.bf16.gmra.mxu0 %v1530_v42  ;;  %401 = vmatmul.bf16.gmra.mxu1 %v1535_v43 }
 0x149   :  { %506 = vmatpush.msra.mxu0 %v485_v55 }
 0x14b   :  { %507 = vmatpush.msra.mxu0 %v484_v56 }
 0x14d   :  { %508 = vmatpush.msra.mxu0 %v483_v57 }
 0x14f   :  { %509 = vmatpush.msra.mxu0 %v482_v58 }
 0x151   :  { %510 = vmatpush.msra.mxu0 %v481_v60 }
 0x153   :  { %511 = vmatpush.msra.mxu0 %v480_v61 }
 0x155   :  { %512 = vmatpush.msra.mxu0 %v479_v62 }
 0x157   :  { %513 = vmatpush.msra.mxu0 %v478_v63 }
 0x158   :  { %406 = vmatmul.bf16.gmra.mxu1 %v1542_v44 }
 0x168   :  { %411 = vmatmul.bf16.gmra.mxu1 %v1548_v45 }
 0x178   :  { %416 = vmatmul.bf16.gmra.mxu1 %v1575_v53 }
 0x188   :  { %421 = vmatmul.bf16.gmra.mxu1 %v1596_v59 }
 0x1b5   :  { %v387_v1 = vpop.f32.mrf.mxu0  ;;  %v397_v2 = vpop.f32.mrf.mxu1 }
 0x1b6   :  { %v427_v3 = vadd.f32 %v387_v1, %v1487_v26  ;;  %v431_v4 = vadd.f32 %v397_v2, %v1467_v16 }
 0x1b8   :  { %v446_v5 = vadd.f32 %v1614_v0, %v427_v3  ;;  %v450_v6 = vadd.f32 %v1614_v0, %v431_v4 }
 0x1ba   :  { %v462_v7 = vmax.f32 %v446_v5, 0.0  ;;  %v466_v8 = vmax.f32 %v450_v6, 0.0 }
 0x1bc   :  { %514 = vmatmul.f32.vlgmr.msra.gmra.mxu0 %v462_v7  ;;  %526 = vmatmul.f32.vlgmr.msra.gmra.mxu2 %v466_v8 }
 0x1bd   :  { %v389_v9 = vpop.f32.mrf.mxu0  ;;  %v399_v10 = vpop.f32.mrf.mxu1 }
 0x1be   :  { %v428_v11 = vadd.f32 %v389_v9, %v1495_v30  ;;  %v432_v12 = vadd.f32 %v399_v10, %v1469_v17 }
 0x1c0   :  { %v447_v13 = vadd.f32 %v1614_v0, %v428_v11  ;;  %v451_v14 = vadd.f32 %v1614_v0, %v432_v12 }
 0x1c2   :  { %v463_v15 = vmax.f32 %v447_v13, 0.0  ;;  %v467_v16 = vmax.f32 %v451_v14, 0.0 }
 0x1c4   :  { %517 = vmatmul.f32.gmra.mxu0 %v463_v15  ;;  %529 = vmatmul.f32.gmra.mxu2 %v467_v16 }
 0x1c5   :  { %v392_v26 = vpop.f32.mrf.mxu0  ;;  %v402_v29 = vpop.f32.mrf.mxu1 }
 0x1c6   :  { %v429_v31 = vadd.f32 %v392_v26, %v1501_v33  ;;  %v433_v32 = vadd.f32 %v402_v29, %v1471_v18 }
 0x1c8   :  { %v448_v34 = vadd.f32 %v1614_v0, %v429_v31  ;;  %v452_v30 = vadd.f32 %v1614_v0, %v433_v32 }
 0x1ca   :  { %v464_v35 = vmax.f32 %v448_v34, 0.0  ;;  %v468_v17 = vmax.f32 %v452_v30, 0.0 }
 0x1cc   :  { %520 = vmatmul.f32.gmra.mxu0 %v464_v35  ;;  %532 = vmatmul.f32.gmra.mxu2 %v468_v17  ;;  %v1139_v35 = vld [vmem:[#allocation2] ss:$0 sm:$0xff] }
 0x1cd   :  { %v394_v36 = vpop.f32.mrf.mxu0  ;;  %v404_v38 = vpop.f32.mrf.mxu1 }
 0x1ce   :  { %v430_v39 = vadd.f32 %v394_v36, %v1509_v37  ;;  %v434_v46 = vadd.f32 %v404_v38, %v1473_v19 }
 0x1d0   :  { %v449_v47 = vadd.f32 %v1614_v0, %v430_v39  ;;  %v453_v33 = vadd.f32 %v1614_v0, %v434_v46 }
 0x1d2   :  { %v465_v48 = vmax.f32 %v449_v47, 0.0  ;;  %v469_v18 = vmax.f32 %v453_v33, 0.0 }
 0x1d4   :  { %523 = vmatmul.f32.gmra.mxu0 %v465_v48  ;;  %535 = vmatmul.f32.gmra.mxu2 %v469_v18 }
 0x1d5   :  { %v407_v49 = vpop.f32.mrf.mxu1 }
 0x1d6   :  { %v435_v50 = vadd.f32 %v407_v49, %v1475_v20 }
 0x1d8   :  { %v454_v51 = vadd.f32 %v1614_v0, %v435_v50 }
 0x1da   :  { %v470_v52 = vmax.f32 %v454_v51, 0.0 }
 0x1dc   :  { %538 = vmatmul.f32.gmra.mxu2 %v470_v52 }
 0x1dd   :  { %v409_v54 = vpop.f32.mrf.mxu1 }
 0x1de   :  { %v436_v37 = vadd.f32 %v409_v54, %v1477_v21 }
 0x1e0   :  { %v455_v19 = vadd.f32 %v1614_v0, %v436_v37 }
 0x1e2   :  { %v471_v55 = vmax.f32 %v455_v19, 0.0 }
 0x1e4   :  { %541 = vmatmul.f32.gmra.mxu2 %v471_v55 }
 0x1e5   :  { %v412_v56 = vpop.f32.mrf.mxu1 }
 0x1e6   :  { %v437_v57 = vadd.f32 %v412_v56, %v1479_v22 }
 0x1e8   :  { %v456_v58 = vadd.f32 %v1614_v0, %v437_v57 }
 0x1ea   :  { %v472_v60 = vmax.f32 %v456_v58, 0.0 }
 0x1ec   :  { %544 = vmatmul.f32.gmra.mxu2 %v472_v60 }
 0x1ed   :  { %v414_v61 = vpop.f32.mrf.mxu1 }
 0x1ee   :  { %v438_v20 = vadd.f32 %v414_v61, %v1481_v23 }
 0x1f0   :  { %v457_v62 = vadd.f32 %v1614_v0, %v438_v20 }
 0x1f2   :  { %v473_v63 = vmax.f32 %v457_v62, 0.0 }
 0x1f4   :  { %547 = vmatmul.f32.gmra.mxu2 %v473_v63 }
 0x1f5   :  { %v417_v1 = vpop.f32.mrf.mxu1 }
 0x1f6   :  { %v439_v21 = vadd.f32 %v417_v1, %v1483_v24 }
 0x1f8   :  { %v458_v2 = vadd.f32 %v1614_v0, %v439_v21 }
 0x1fa   :  { %v474_v3 = vmax.f32 %v458_v2, 0.0 }
 0x1fc   :  { %550 = vmatmul.f32.gmra.mxu2 %v474_v3 }
 0x1fd   :  { %v419_v4 = vpop.f32.mrf.mxu1 }
 0x1fe   :  { %v440_v22 = vadd.f32 %v419_v4, %v1485_v25 }
 0x200   :  { %v459_v5 = vadd.f32 %v1614_v0, %v440_v22 }
 0x202   :  { %v475_v6 = vmax.f32 %v459_v5, 0.0 }
 0x204   :  { %553 = vmatmul.f32.gmra.mxu2 %v475_v6 }
 0x205   :  { %v422_v7 = vpop.f32.mrf.mxu1 }
 0x206   :  { %v441_v23 = vadd.f32 %v422_v7, %v1489_v27 }
 0x208   :  { %v460_v8 = vadd.f32 %v1614_v0, %v441_v23 }
 0x20a   :  { %v476_v9 = vmax.f32 %v460_v8, 0.0 }
 0x20c   :  { %556 = vmatmul.f32.gmra.mxu2 %v476_v9 }
 0x20d   :  { %v424_v10 = vpop.f32.mrf.mxu1 }
 0x20e   :  { %v442_v24 = vadd.f32 %v424_v10, %v1491_v28 }
 0x210   :  { %v461_v11 = vadd.f32 %v1614_v0, %v442_v24 }
 0x212   :  { %v477_v12 = vmax.f32 %v461_v11, 0.0 }
 0x214   :  { %559 = vmatmul.f32.gmra.mxu2 %v477_v12 }
 0x239   :  { %v515_v34 = vpop.f32.mrf.mxu0 }
 0x23a   :  { %v516_v9 = vadd.f32 %v1139_v35, %v515_v34  ;;  %v652_v34 = vld [vmem:[%s1821_s6] sm:$0xff] }
 0x23c   :  { %v563_v12 = vmax.f32 %v516_v9, 0.0 }
 0x23f   :  { %v527_v13 = vpop.f32.mrf.mxu2 }
 0x240   :  { %v1695_v21 = vadd.f32 %v1139_v35, %v527_v13 }
 0x241   :  { %v518_v17 = vpop.f32.mrf.mxu0 }
 0x242   :  { %v567_v5 = vmax.f32 %v1695_v21, 0.0  ;;  %v519_v7 = vadd.f32 %v1139_v35, %v518_v17 }
 0x244   :  { %v564_v24 = vmax.f32 %v519_v7, 0.0 }
 0x246   :  { %v579_v13 = vpack.c.bf16 %v564_v24, %v563_v12 }
 0x247   :  { %v530_v25 = vpop.f32.mrf.mxu2 }
 0x248   :  { %v1688_v20 = vadd.f32 %v1139_v35, %v530_v25  ;;  %v667_v25 = vld [vmem:[%s1821_s6 + $0x78] sm:$0xff] }
 0x249   :  { %v521_v51 = vpop.f32.mrf.mxu0  ;;  %672 = vmatpush.msrb.mxu0 %v667_v25  ;;  %v756_v25 = vld [vmem:[#allocation7 + $0x18] sm:$0xff] }
 0x24a   :  { %v568_v3 = vmax.f32 %v1688_v20, 0.0  ;;  %v522_v6 = vadd.f32 %v1139_v35, %v521_v51  ;;  %v767_v20 = vld [vmem:[#allocation7 + $0x70] sm:$0xff] }
 0x24c   :  { %v581_v8 = vpack.c.bf16 %v568_v3, %v567_v5  ;;  %v565_v10 = vmax.f32 %v522_v6, 0.0 }
 0x24f   :  { %v533_v14 = vpop.f32.mrf.mxu2 }
 0x250   :  { %v1685_v60 = vadd.f32 %v1139_v35, %v533_v14  ;;  %v666_v14 = vld [vmem:[%s1821_s6 + $0x70] sm:$0xff] }
 0x251   :  { %v524_v1 = vpop.f32.mrf.mxu0  ;;  %673 = vmatpush.msrb.mxu0 %v666_v14 }
 0x252   :  { %v569_v2 = vmax.f32 %v1685_v60, 0.0  ;;  %v1699_v4 = vadd.f32 %v1139_v35, %v524_v1 }
 0x254   :  { %v566_v23 = vmax.f32 %v1699_v4, 0.0 }
 0x256   :  { %v580_v11 = vpack.c.bf16 %v566_v23, %v565_v10 }
 0x257   :  { %v536_v15 = vpop.f32.mrf.mxu2 }
 0x258   :  { %v1678_v56 = vadd.f32 %v1139_v35, %v536_v15  ;;  %v660_v15 = vld [vmem:[%s1821_s6 + $0x40] sm:$0xff] }
 0x25a   :  { %v570_v62 = vmax.f32 %v1678_v56, 0.0  ;;  %v764_v56 = vld [vmem:[#allocation7 + $0x58] sm:$0xff] }
 0x25c   :  { %v582_v22 = vpack.c.bf16 %v570_v62, %v569_v2 }
 0x25f   :  { %v539_v16 = vpop.f32.mrf.mxu2 }
 0x260   :  { %v1675_v19 = vadd.f32 %v1139_v35, %v539_v16  ;;  %v659_v16 = vld [vmem:[%s1821_s6 + $0x38] sm:$0xff] }
 0x262   :  { %v571_v61 = vmax.f32 %v1675_v19, 0.0 }
 0x267   :  { %v542_v26 = vpop.f32.mrf.mxu2 }
 0x268   :  { %v1668_v52 = vadd.f32 %v1139_v35, %v542_v26  ;;  %v657_v26 = vld [vmem:[%s1821_s6 + $0x28] sm:$0xff] }
 0x26a   :  { %v572_v57 = vmax.f32 %v1668_v52, 0.0  ;;  %v759_v52 = vld [vmem:[#allocation7 + $0x30] sm:$0xff] }
 0x26c   :  { %v583_v63 = vpack.c.bf16 %v572_v57, %v571_v61 }
 0x26f   :  { %v545_v29 = vpop.f32.mrf.mxu2 }
 0x270   :  { %v1665_v49 = vadd.f32 %v1139_v35, %v545_v29  ;;  %v656_v29 = vld [vmem:[%s1821_s6 + $0x20] sm:$0xff] }
 0x272   :  { %v573_v55 = vmax.f32 %v1665_v49, 0.0  ;;  %v755_v49 = vld [vmem:[#allocation7 + $0x10] sm:$0xff] }
 0x277   :  { %v548_v31 = vpop.f32.mrf.mxu2 }
 0x278   :  { %v1658_v33 = vadd.f32 %v1139_v35, %v548_v31  ;;  %v655_v31 = vld [vmem:[%s1821_s6 + $0x18] sm:$0xff] }
 0x27a   :  { %v574_v54 = vmax.f32 %v1658_v33, 0.0 }
 0x27c   :  { %v584_v58 = vpack.c.bf16 %v574_v54, %v573_v55 }
 0x27f   :  { %v551_v27 = vpop.f32.mrf.mxu2 }
 0x280   :  { %v1654_v39 = vadd.f32 %v1139_v35, %v551_v27  ;;  %v654_v27 = vld [vmem:[%s1821_s6 + $0x10] sm:$0xff] }
 0x282   :  { %v575_v50 = vmax.f32 %v1654_v39, 0.0 }
 0x287   :  { %v554_v32 = vpop.f32.mrf.mxu2 }
 0x288   :  { %v1650_v0 = vadd.f32 %v1139_v35, %v554_v32  ;;  %v653_v32 = vld [vmem:[%s1821_s6 + $0x8] sm:$0xff] }
 0x28a   :  { %v576_v48 = vmax.f32 %v1650_v0, 0.0 }
 0x28c   :  { %v585_v37 = vpack.c.bf16 %v576_v48, %v575_v50 }
 0x28f   :  { %v557_v30 = vpop.f32.mrf.mxu2 }
 0x290   :  { %v1648_v36 = vadd.f32 %v1139_v35, %v557_v30 }
 0x292   :  { %v577_v46 = vmax.f32 %v1648_v36, 0.0 }
 0x297   :  { %v560_v28 = vpop.f32.mrf.mxu2 }
 0x298   :  { %v1652_v38 = vadd.f32 %v1139_v35, %v560_v28 }
 0x29a   :  { %v578_v47 = vmax.f32 %v1652_v38, 0.0 }
 0x29c   :  { %v586_v18 = vpack.c.bf16 %v578_v47, %v577_v46 }
 0x29e   :  { %587 = vmatpush.bf16.msrb.mxu3 %v586_v18 }
 0x2a2   :  { %588 = vmatpush.bf16.msrb.mxu3 %v585_v37 }
 0x2a6   :  { %589 = vmatpush.bf16.msrb.mxu3 %v584_v58 }
 0x2aa   :  { %590 = vmatpush.bf16.msrb.mxu3 %v583_v63 }
 0x2ae   :  { %591 = vmatpush.bf16.msrb.mxu3 %v582_v22 }
 0x2b2   :  { %592 = vmatpush.bf16.msrb.mxu3 %v581_v8  ;;  %v765_v8 = vld [vmem:[#allocation7 + $0x60] sm:$0xff] }
 0x2b6   :  { %593 = vmatpush.bf16.msrb.mxu3 %v580_v11 }
 0x2ba   :  { %594 = vmatpush.bf16.msrb.mxu3 %v579_v13  ;;  %v757_v13 = vld [vmem:[#allocation7 + $0x20] sm:$0xff] }
 0x2bd   :  { %595 = vmatmul.bf16.vlgmr.msrb.gmra.mxu3 %v1518_v40  ;;  %v665_v40 = vld [vmem:[%s1821_s6 + $0x68] sm:$0xff] }
 0x2be   :  { %674 = vmatpush.msrb.mxu0 %v665_v40  ;;  %v754_v40 = vld [vmem:[#allocation7 + $0x8] sm:$0xff] }
 0x2cd   :  { %600 = vmatmul.bf16.gmra.mxu3 %v1530_v42  ;;  %v663_v42 = vld [vmem:[%s1821_s6 + $0x58] sm:$0xff] }
 0x2dd   :  { %605 = vmatmul.bf16.gmra.mxu3 %v1523_v41  ;;  %v664_v41 = vld [vmem:[%s1821_s6 + $0x60] sm:$0xff] }
 0x2de   :  { %675 = vmatpush.msrb.mxu0 %v664_v41  ;;  %v753_v41 = vld [vmem:[#allocation7] sm:$0xff] }
 0x2e0   :  { %676 = vmatpush.msrb.mxu0 %v663_v42 }
 0x2ed   :  { %610 = vmatmul.bf16.gmra.mxu3 %v1535_v43  ;;  %v662_v43 = vld [vmem:[%s1821_s6 + $0x50] sm:$0xff] }
 0x2ee   :  { %677 = vmatpush.msrb.mxu0 %v662_v43 }
 0x2fd   :  { %615 = vmatmul.bf16.gmra.mxu3 %v1542_v44  ;;  %v661_v44 = vld [vmem:[%s1821_s6 + $0x48] sm:$0xff] }
 0x2fe   :  { %678 = vmatpush.msrb.mxu0 %v661_v44 }
 0x300   :  { %679 = vmatpush.msrb.mxu0 %v660_v15 }
 0x302   :  { %680 = vmatpush.msrb.mxu0 %v659_v16 }
 0x30d   :  { %620 = vmatmul.bf16.gmra.mxu3 %v1548_v45  ;;  %v658_v45 = vld [vmem:[%s1821_s6 + $0x30] sm:$0xff]  ;;  %s1329_s6 = smov [#allocation13]  }
 0x30e   :  { %681 = vmatpush.msrb.mxu0 %v658_v45  ;;  %s959_s5 = sshll.u32 %s1329_s6, 4  ;;  %s960_s5 = int_to_ptr.vmem [resolvable:$true] %s959_s5 }
 0x310   :  { %682 = vmatpush.msrb.mxu0 %v657_v26 }
 0x312   :  { %683 = vmatpush.msrb.mxu0 %v656_v29 }
 0x314   :  { %684 = vmatpush.msrb.mxu0 %v655_v31 }
 0x316   :  { %685 = vmatpush.msrb.mxu0 %v654_v27 }
 0x318   :  { %686 = vmatpush.msrb.mxu0 %v653_v32 }
 0x31a   :  { %687 = vmatpush.msrb.mxu0 %v652_v34 }
 0x31d   :  { %625 = vmatmul.bf16.gmra.mxu3 %v1575_v53 }
 0x32d   :  { %630 = vmatmul.bf16.gmra.mxu3 %v1596_v59 }
 0x340   :  { %v596_v30 = vpop.f32.mrf.mxu3 }
 0x341   :  { %v636_v35 = vadd.f32 %v596_v30, %v563_v12  ;;  %v758_v12 = vld [vmem:[#allocation7 + $0x28] sm:$0xff] }
 0x343   :  { %688 = vmatmul.f32.vlgmr.msrb.gmra.mxu0 %v636_v35 }
 0x348   :  { %v598_v17 = vpop.f32.mrf.mxu3 }
 0x349   :  { %v637_v28 = vadd.f32 %v598_v17, %v564_v24  ;;  %v760_v24 = vld [vmem:[#allocation7 + $0x38] sm:$0xff] }
 0x34b   :  { %691 = vmatmul.f32.gmra.mxu0 %v637_v28 }
 0x350   :  { %v601_v53 = vpop.f32.mrf.mxu3 }
 0x351   :  { %v638_v18 = vadd.f32 %v601_v53, %v565_v10  ;;  %v761_v10 = vld [vmem:[#allocation7 + $0x40] sm:$0xff] }
 0x353   :  { %694 = vmatmul.f32.gmra.mxu0 %v638_v18 }
 0x358   :  { %v603_v51 = vpop.f32.mrf.mxu3 }
 0x359   :  { %v639_v37 = vadd.f32 %v603_v51, %v566_v23 }
 0x35b   :  { %697 = vmatmul.f32.gmra.mxu0 %v639_v37 }
 0x360   :  { %v606_v58 = vpop.f32.mrf.mxu3 }
 0x361   :  { %v640_v63 = vadd.f32 %v606_v58, %v567_v5  ;;  %v768_v5 = vld [vmem:[#allocation7 + $0x78] sm:$0xff] }
 0x362   :  { %773 = vmatpush.msrb.mxu1 %v768_v5  ;;  %v866_v5 = vld [vmem:[#allocation10 + $0x60] sm:$0xff] }
 0x363   :  { %700 = vmatmul.f32.gmra.mxu0 %v640_v63 }
 0x364   :  { %774 = vmatpush.msrb.mxu1 %v767_v20  ;;  %v865_v20 = vld [vmem:[#allocation10 + $0x58] sm:$0xff] }
 0x368   :  { %v608_v1 = vpop.f32.mrf.mxu3 }
 0x369   :  { %v641_v59 = vadd.f32 %v608_v1, %v568_v3 }
 0x36b   :  { %703 = vmatmul.f32.gmra.mxu0 %v641_v59 }
 0x370   :  { %v611_v4 = vpop.f32.mrf.mxu3 }
 0x371   :  { %v642_v22 = vadd.f32 %v611_v4, %v569_v2  ;;  %v766_v2 = vld [vmem:[#allocation7 + $0x68] sm:$0xff]  ;;  %v869_v4 = vld [vmem:[#allocation10 + $0x78] sm:$0xff] }
 0x372   :  { %775 = vmatpush.msrb.mxu1 %v766_v2  ;;  %874 = vmatpush.msrb.mxu2 %v869_v4  ;;  %v864_v2 = vld [vmem:[#allocation10 + $0x50] sm:$0xff] }
 0x373   :  { %706 = vmatmul.f32.gmra.mxu0 %v642_v22 }
 0x374   :  { %776 = vmatpush.msrb.mxu1 %v765_v8 }
 0x376   :  { %777 = vmatpush.msrb.mxu1 %v764_v56  ;;  %v863_v56 = vld [vmem:[#allocation10 + $0x48] sm:$0xff] }
 0x378   :  { %v613_v6 = vpop.f32.mrf.mxu3 }
 0x379   :  { %v643_v7 = vadd.f32 %v613_v6, %v570_v62  ;;  %v763_v62 = vld [vmem:[#allocation7 + $0x50] sm:$0xff] }
 0x37a   :  { %778 = vmatpush.msrb.mxu1 %v763_v62  ;;  %v862_v62 = vld [vmem:[#allocation10 + $0x40] sm:$0xff] }
 0x37b   :  { %709 = vmatmul.f32.gmra.mxu0 %v643_v7  ;;  %v868_v7 = vld [vmem:[#allocation10 + $0x70] sm:$0xff] }
 0x37c   :  { %875 = vmatpush.msrb.mxu2 %v868_v7 }
 0x380   :  { %v616_v23 = vpop.f32.mrf.mxu3 }
 0x381   :  { %v644_v21 = vadd.f32 %v616_v23, %v571_v61  ;;  %v762_v61 = vld [vmem:[#allocation7 + $0x48] sm:$0xff] }
 0x382   :  { %779 = vmatpush.msrb.mxu1 %v762_v61 }
 0x383   :  { %712 = vmatmul.f32.gmra.mxu0 %v644_v21  ;;  %v867_v21 = vld [vmem:[#allocation10 + $0x68] sm:$0xff] }
 0x384   :  { %780 = vmatpush.msrb.mxu1 %v761_v10  ;;  %876 = vmatpush.msrb.mxu2 %v867_v21  ;;  %v860_v10 = vld [vmem:[#allocation10 + $0x30] sm:$0xff] }
 0x386   :  { %781 = vmatpush.msrb.mxu1 %v760_v24  ;;  %877 = vmatpush.msrb.mxu2 %v866_v5 }
 0x388   :  { %v618_v3 = vpop.f32.mrf.mxu3  ;;  %782 = vmatpush.msrb.mxu1 %v759_v52  ;;  %878 = vmatpush.msrb.mxu2 %v865_v20  ;;  %v859_v52 = vld [vmem:[#allocation10 + $0x28] sm:$0xff] }
 0x389   :  { %v645_v60 = vadd.f32 %v618_v3, %v572_v57 }
 0x38a   :  { %783 = vmatpush.msrb.mxu1 %v758_v12  ;;  %879 = vmatpush.msrb.mxu2 %v864_v2 }
 0x38b   :  { %715 = vmatmul.f32.gmra.mxu0 %v645_v60 }
 0x38c   :  { %784 = vmatpush.msrb.mxu1 %v757_v13  ;;  %880 = vmatpush.msrb.mxu2 %v863_v56 }
 0x38e   :  { %785 = vmatpush.msrb.mxu1 %v756_v25  ;;  %881 = vmatpush.msrb.mxu2 %v862_v62  ;;  %v856_v25 = vld [vmem:[#allocation10 + $0x10] sm:$0xff] }
 0x390   :  { %v621_v9 = vpop.f32.mrf.mxu3  ;;  %786 = vmatpush.msrb.mxu1 %v755_v49 }
 0x391   :  { %v646_v19 = vadd.f32 %v621_v9, %v573_v55  ;;  %v861_v9 = vld [vmem:[#allocation10 + $0x38] sm:$0xff] }
 0x392   :  { %787 = vmatpush.msrb.mxu1 %v754_v40  ;;  %882 = vmatpush.msrb.mxu2 %v861_v9 }
 0x393   :  { %718 = vmatmul.f32.gmra.mxu0 %v646_v19 }
 0x394   :  { %788 = vmatpush.msrb.mxu1 %v753_v41  ;;  %883 = vmatpush.msrb.mxu2 %v860_v10 }
 0x396   :  { %884 = vmatpush.msrb.mxu2 %v859_v52 }
 0x398   :  { %v623_v57 = vpop.f32.mrf.mxu3 }
 0x399   :  { %v647_v11 = vadd.f32 %v623_v57, %v574_v54  ;;  %v858_v57 = vld [vmem:[#allocation10 + $0x20] sm:$0xff] }
 0x39a   :  { %885 = vmatpush.msrb.mxu2 %v858_v57 }
 0x39b   :  { %721 = vmatmul.f32.gmra.mxu0 %v647_v11  ;;  %v857_v11 = vld [vmem:[#allocation10 + $0x18] sm:$0xff] }
 0x39c   :  { %886 = vmatpush.msrb.mxu2 %v857_v11 }
 0x39e   :  { %887 = vmatpush.msrb.mxu2 %v856_v25 }
 0x3a0   :  { %v626_v55 = vpop.f32.mrf.mxu3 }
 0x3a1   :  { %v648_v14 = vadd.f32 %v626_v55, %v575_v50  ;;  %v1791_v50 = vld [vmem:[#allocation5] ss:$0 sm:$0xff]  ;;  %v855_v55 = vld [vmem:[#allocation10 + $0x8] sm:$0xff] }
 0x3a2   :  { %888 = vmatpush.msrb.mxu2 %v855_v55 }
 0x3a3   :  { %724 = vmatmul.f32.gmra.mxu0 %v648_v14  ;;  %v854_v14 = vld [vmem:[#allocation10] sm:$0xff] }
 0x3a4   :  { %889 = vmatpush.msrb.mxu2 %v854_v14 }
 0x3a8   :  { %v628_v33 = vpop.f32.mrf.mxu3 }
 0x3a9   :  { %v649_v54 = vadd.f32 %v628_v33, %v576_v48 }
 0x3ab   :  { %727 = vmatmul.f32.gmra.mxu0 %v649_v54 }
 0x3b0   :  { %v631_v42 = vpop.f32.mrf.mxu3 }
 0x3b1   :  { %v650_v43 = vadd.f32 %v631_v42, %v577_v46 }
 0x3b3   :  { %730 = vmatmul.f32.gmra.mxu0 %v650_v43 }
 0x3b8   :  { %v633_v44 = vpop.f32.mrf.mxu3 }
 0x3b9   :  { %v651_v39 = vadd.f32 %v633_v44, %v578_v47 }
 0x3bb   :  { %733 = vmatmul.f32.gmra.mxu0 %v651_v39 }
 0x3c0   :  { %v689_v15 = vpop.f32.mrf.mxu0 }
 0x3c1   :  { %v690_v16 = vadd.f32 %v1791_v50, %v689_v15 }
 0x3c3   :  { %v737_v45 = vmax.f32 %v690_v16, 0.0  ;;  %v1141_v16 = vld [vmem:[#allocation8] ss:$0 sm:$0xff] }
 0x3c5   :  { %789 = vmatmul.f32.vlgmr.msrb.gmra.mxu1 %v737_v45 }
 0x3c8   :  { %v692_v0 = vpop.f32.mrf.mxu0 }
 0x3c9   :  { %v693_v48 = vadd.f32 %v1791_v50, %v692_v0 }
 0x3cb   :  { %v738_v26 = vmax.f32 %v693_v48, 0.0 }
 0x3cd   :  { %792 = vmatmul.f32.gmra.mxu1 %v738_v26 }
 0x3d0   :  { %v695_v36 = vpop.f32.mrf.mxu0 }
 0x3d1   :  { %v696_v46 = vadd.f32 %v1791_v50, %v695_v36 }
 0x3d3   :  { %v739_v29 = vmax.f32 %v696_v46, 0.0 }
 0x3d5   :  { %795 = vmatmul.f32.gmra.mxu1 %v739_v29 }
 0x3d8   :  { %v698_v38 = vpop.f32.mrf.mxu0 }
 0x3d9   :  { %v699_v47 = vadd.f32 %v1791_v50, %v698_v38 }
 0x3db   :  { %v740_v31 = vmax.f32 %v699_v47, 0.0 }
 0x3dd   :  { %798 = vmatmul.f32.gmra.mxu1 %v740_v31 }
 0x3e0   :  { %v701_v27 = vpop.f32.mrf.mxu0 }
 0x3e1   :  { %v702_v32 = vadd.f32 %v1791_v50, %v701_v27 }
 0x3e3   :  { %v741_v34 = vmax.f32 %v702_v32, 0.0 }
 0x3e5   :  { %801 = vmatmul.f32.gmra.mxu1 %v741_v34 }
 0x3e8   :  { %v704_v30 = vpop.f32.mrf.mxu0 }
 0x3e9   :  { %v705_v35 = vadd.f32 %v1791_v50, %v704_v30 }
 0x3eb   :  { %v742_v17 = vmax.f32 %v705_v35, 0.0 }
 0x3ed   :  { %804 = vmatmul.f32.gmra.mxu1 %v742_v17 }
 0x3f0   :  { %v707_v28 = vpop.f32.mrf.mxu0 }
 0x3f1   :  { %v708_v53 = vadd.f32 %v1791_v50, %v707_v28 }
 0x3f3   :  { %v743_v18 = vmax.f32 %v708_v53, 0.0 }
 0x3f5   :  { %807 = vmatmul.f32.gmra.mxu1 %v743_v18 }
 0x3f8   :  { %v710_v51 = vpop.f32.mrf.mxu0 }
 0x3f9   :  { %v711_v37 = vadd.f32 %v1791_v50, %v710_v51 }
 0x3fb   :  { %v744_v58 = vmax.f32 %v711_v37, 0.0 }
 0x3fd   :  { %810 = vmatmul.f32.gmra.mxu1 %v744_v58 }
 0x400   :  { %v713_v63 = vpop.f32.mrf.mxu0 }
 0x401   :  { %v714_v1 = vadd.f32 %v1791_v50, %v713_v63 }
 0x403   :  { %v745_v59 = vmax.f32 %v714_v1, 0.0 }
 0x405   :  { %813 = vmatmul.f32.gmra.mxu1 %v745_v59 }
 0x408   :  { %v716_v22 = vpop.f32.mrf.mxu0 }
 0x409   :  { %v717_v6 = vadd.f32 %v1791_v50, %v716_v22 }
 0x40b   :  { %v746_v23 = vmax.f32 %v717_v6, 0.0 }
 0x40d   :  { %816 = vmatmul.f32.gmra.mxu1 %v746_v23 }
 0x410   :  { %v719_v3 = vpop.f32.mrf.mxu0 }
 0x411   :  { %v720_v60 = vadd.f32 %v1791_v50, %v719_v3 }
 0x413   :  { %v747_v8 = vmax.f32 %v720_v60, 0.0 }
 0x415   :  { %819 = vmatmul.f32.gmra.mxu1 %v747_v8 }
 0x418   :  { %v722_v19 = vpop.f32.mrf.mxu0 }
 0x419   :  { %v723_v61 = vadd.f32 %v1791_v50, %v722_v19 }
 0x41b   :  { %v748_v24 = vmax.f32 %v723_v61, 0.0 }
 0x41d   :  { %822 = vmatmul.f32.gmra.mxu1 %v748_v24 }
 0x420   :  { %v725_v12 = vpop.f32.mrf.mxu0 }
 0x421   :  { %v726_v13 = vadd.f32 %v1791_v50, %v725_v12  ;;  %v1142_v12 = vld [vmem:[#allocation11] ss:$0 sm:$0xff] }
 0x423   :  { %v749_v49 = vmax.f32 %v726_v13, 0.0 }
 0x425   :  { %825 = vmatmul.f32.gmra.mxu1 %v749_v49 }
 0x428   :  { %v728_v40 = vpop.f32.mrf.mxu0 }
 0x429   :  { %v729_v41 = vadd.f32 %v1791_v50, %v728_v40 }
 0x42b   :  { %v750_v33 = vmax.f32 %v729_v41, 0.0 }
 0x42d   :  { %828 = vmatmul.f32.gmra.mxu1 %v750_v33 }
 0x430   :  { %v731_v54 = vpop.f32.mrf.mxu0 }
 0x431   :  { %v732_v42 = vadd.f32 %v1791_v50, %v731_v54 }
 0x433   :  { %v751_v43 = vmax.f32 %v732_v42, 0.0 }
 0x435   :  { %831 = vmatmul.f32.gmra.mxu1 %v751_v43 }
 0x438   :  { %v734_v44 = vpop.f32.mrf.mxu0 }
 0x439   :  { %v735_v39 = vadd.f32 %v1791_v50, %v734_v44 }
 0x43b   :  { %v752_v15 = vmax.f32 %v735_v39, 0.0 }
 0x43d   :  { %834 = vmatmul.f32.gmra.mxu1 %v752_v15 }
 0x442   :  { %v790_v45 = vpop.f32.mrf.mxu1 }
 0x443   :  { %v791_v0 = vadd.f32 %v1141_v16, %v790_v45 }
 0x445   :  { %v838_v48 = vmax.f32 %v791_v0, 0.0 }
 0x447   :  { %890 = vmatmul.f32.vlgmr.msrb.gmra.mxu2 %v838_v48 }
 0x44a   :  { %v793_v26 = vpop.f32.mrf.mxu1 }
 0x44b   :  { %v794_v36 = vadd.f32 %v1141_v16, %v793_v26 }
 0x44d   :  { %v839_v46 = vmax.f32 %v794_v36, 0.0 }
 0x44f   :  { %893 = vmatmul.f32.gmra.mxu2 %v839_v46 }
 0x452   :  { %v796_v29 = vpop.f32.mrf.mxu1 }
 0x453   :  { %v797_v38 = vadd.f32 %v1141_v16, %v796_v29 }
 0x455   :  { %v840_v47 = vmax.f32 %v797_v38, 0.0 }
 0x457   :  { %896 = vmatmul.f32.gmra.mxu2 %v840_v47 }
 0x45a   :  { %v799_v31 = vpop.f32.mrf.mxu1 }
 0x45b   :  { %v800_v27 = vadd.f32 %v1141_v16, %v799_v31 }
 0x45d   :  { %v841_v32 = vmax.f32 %v800_v27, 0.0 }
 0x45f   :  { %899 = vmatmul.f32.gmra.mxu2 %v841_v32 }
 0x462   :  { %v802_v50 = vpop.f32.mrf.mxu1 }
 0x463   :  { %v803_v34 = vadd.f32 %v1141_v16, %v802_v50 }
 0x465   :  { %v842_v30 = vmax.f32 %v803_v34, 0.0 }
 0x467   :  { %902 = vmatmul.f32.gmra.mxu2 %v842_v30 }
 0x46a   :  { %v805_v35 = vpop.f32.mrf.mxu1 }
 0x46b   :  { %v806_v17 = vadd.f32 %v1141_v16, %v805_v35 }
 0x46d   :  { %v843_v28 = vmax.f32 %v806_v17, 0.0 }
 0x46f   :  { %905 = vmatmul.f32.gmra.mxu2 %v843_v28 }
 0x472   :  { %v808_v53 = vpop.f32.mrf.mxu1 }
 0x473   :  { %v809_v18 = vadd.f32 %v1141_v16, %v808_v53 }
 0x475   :  { %v844_v51 = vmax.f32 %v809_v18, 0.0 }
 0x477   :  { %908 = vmatmul.f32.gmra.mxu2 %v844_v51 }
 0x47a   :  { %v811_v37 = vpop.f32.mrf.mxu1 }
 0x47b   :  { %v812_v58 = vadd.f32 %v1141_v16, %v811_v37 }
 0x47d   :  { %v845_v63 = vmax.f32 %v812_v58, 0.0 }
 0x47f   :  { %911 = vmatmul.f32.gmra.mxu2 %v845_v63 }
 0x482   :  { %v814_v1 = vpop.f32.mrf.mxu1 }
 0x483   :  { %v815_v59 = vadd.f32 %v1141_v16, %v814_v1 }
 0x485   :  { %v846_v4 = vmax.f32 %v815_v59, 0.0 }
 0x487   :  { %914 = vmatmul.f32.gmra.mxu2 %v846_v4 }
 0x48a   :  { %v817_v22 = vpop.f32.mrf.mxu1 }
 0x48b   :  { %v818_v6 = vadd.f32 %v1141_v16, %v817_v22 }
 0x48d   :  { %v847_v7 = vmax.f32 %v818_v6, 0.0 }
 0x48f   :  { %917 = vmatmul.f32.gmra.mxu2 %v847_v7 }
 0x492   :  { %v820_v23 = vpop.f32.mrf.mxu1 }
 0x493   :  { %v821_v21 = vadd.f32 %v1141_v16, %v820_v23 }
 0x495   :  { %v848_v5 = vmax.f32 %v821_v21, 0.0 }
 0x497   :  { %920 = vmatmul.f32.gmra.mxu2 %v848_v5 }
 0x49a   :  { %v823_v20 = vpop.f32.mrf.mxu1 }
 0x49b   :  { %v824_v3 = vadd.f32 %v1141_v16, %v823_v20 }
 0x49d   :  { %v849_v60 = vmax.f32 %v824_v3, 0.0 }
 0x49f   :  { %923 = vmatmul.f32.gmra.mxu2 %v849_v60 }
 0x4a2   :  { %v826_v2 = vpop.f32.mrf.mxu1 }
 0x4a3   :  { %v827_v8 = vadd.f32 %v1141_v16, %v826_v2 }
 0x4a5   :  { %v850_v56 = vmax.f32 %v827_v8, 0.0 }
 0x4a7   :  { %926 = vmatmul.f32.gmra.mxu2 %v850_v56 }
 0x4aa   :  { %v829_v62 = vpop.f32.mrf.mxu1 }
 0x4ab   :  { %v830_v9 = vadd.f32 %v1141_v16, %v829_v62 }
 0x4ad   :  { %v851_v19 = vmax.f32 %v830_v9, 0.0 }
 0x4af   :  { %929 = vmatmul.f32.gmra.mxu2 %v851_v19 }
 0x4b2   :  { %v832_v61 = vpop.f32.mrf.mxu1 }
 0x4b3   :  { %v833_v10 = vadd.f32 %v1141_v16, %v832_v61 }
 0x4b5   :  { %v852_v24 = vmax.f32 %v833_v10, 0.0 }
 0x4b7   :  { %932 = vmatmul.f32.gmra.mxu2 %v852_v24 }
 0x4ba   :  { %v835_v52 = vpop.f32.mrf.mxu1 }
 0x4bb   :  { %v836_v57 = vadd.f32 %v1141_v16, %v835_v52 }
 0x4bd   :  { %v853_v11 = vmax.f32 %v836_v57, 0.0 }
 0x4bf   :  { %935 = vmatmul.f32.gmra.mxu2 %v853_v11 }
 0x4ca   :  { %v891_v13 = vpop.f32.mrf.mxu2 }
 0x4cb   :  { %v892_v25 = vadd.f32 %v1142_v12, %v891_v13 }
 0x4cd   :  { %939 = vst [vmem:[#allocation13] sm:$0xff] %v892_v25 }
 0x4d2   :  { %v894_v49 = vpop.f32.mrf.mxu2 }
 0x4d3   :  { %v895_v55 = vadd.f32 %v1142_v12, %v894_v49 }
 0x4d5   :  { %940 = vst [vmem:[#allocation13 + $0x8] sm:$0xff] %v895_v55 }
 0x4da   :  { %v897_v14 = vpop.f32.mrf.mxu2 }
 0x4db   :  { %v898_v40 = vadd.f32 %v1142_v12, %v897_v14 }
 0x4dd   :  { %941 = vst [vmem:[#allocation13 + $0x10] sm:$0xff] %v898_v40 }
 0x4e2   :  { %v900_v41 = vpop.f32.mrf.mxu2 }
 0x4e3   :  { %v901_v33 = vadd.f32 %v1142_v12, %v900_v41 }
 0x4e5   :  { %942 = vst [vmem:[#allocation13 + $0x18] sm:$0xff] %v901_v33 }
 0x4ea   :  { %v903_v54 = vpop.f32.mrf.mxu2 }
 0x4eb   :  { %v904_v42 = vadd.f32 %v1142_v12, %v903_v54 }
 0x4ed   :  { %943 = vst [vmem:[#allocation13 + $0x20] sm:$0xff] %v904_v42 }
 0x4f2   :  { %v906_v43 = vpop.f32.mrf.mxu2 }
 0x4f3   :  { %v907_v44 = vadd.f32 %v1142_v12, %v906_v43 }
 0x4f5   :  { %944 = vst [vmem:[#allocation13 + $0x28] sm:$0xff] %v907_v44 }
 0x4fa   :  { %v909_v39 = vpop.f32.mrf.mxu2 }
 0x4fb   :  { %v910_v15 = vadd.f32 %v1142_v12, %v909_v39 }
 0x4fd   :  { %945 = vst [vmem:[#allocation13 + $0x30] sm:$0xff] %v910_v15 }
 0x502   :  { %v912_v16 = vpop.f32.mrf.mxu2 }
 0x503   :  { %v913_v45 = vadd.f32 %v1142_v12, %v912_v16 }
 0x505   :  { %946 = vst [vmem:[#allocation13 + $0x38] sm:$0xff] %v913_v45 }
 0x50a   :  { %v915_v0 = vpop.f32.mrf.mxu2 }
 0x50b   :  { %v916_v48 = vadd.f32 %v1142_v12, %v915_v0 }
 0x50d   :  { %947 = vst [vmem:[#allocation13 + $0x40] sm:$0xff] %v916_v48 }
 0x512   :  { %v918_v26 = vpop.f32.mrf.mxu2 }
 0x513   :  { %v919_v36 = vadd.f32 %v1142_v12, %v918_v26 }
 0x515   :  { %948 = vst [vmem:[#allocation13 + $0x48] sm:$0xff] %v919_v36 }
 0x51a   :  { %v921_v46 = vpop.f32.mrf.mxu2 }
 0x51b   :  { %v922_v29 = vadd.f32 %v1142_v12, %v921_v46 }
 0x51d   :  { %949 = vst [vmem:[#allocation13 + $0x50] sm:$0xff] %v922_v29 }
 0x522   :  { %v924_v38 = vpop.f32.mrf.mxu2 }
 0x523   :  { %v925_v47 = vadd.f32 %v1142_v12, %v924_v38 }
 0x525   :  { %950 = vst [vmem:[#allocation13 + $0x58] sm:$0xff] %v925_v47 }
 0x52a   :  { %v927_v31 = vpop.f32.mrf.mxu2 }
 0x52b   :  { %v928_v27 = vadd.f32 %v1142_v12, %v927_v31 }
 0x52d   :  { %951 = vst [vmem:[#allocation13 + $0x60] sm:$0xff] %v928_v27 }
 0x532   :  { %v930_v32 = vpop.f32.mrf.mxu2 }
 0x533   :  { %v931_v50 = vadd.f32 %v1142_v12, %v930_v32 }
 0x535   :  { %952 = vst [vmem:[#allocation13 + $0x68] sm:$0xff] %v931_v50 }
 0x53a   :  { %v933_v34 = vpop.f32.mrf.mxu2 }
 0x53b   :  { %v934_v30 = vadd.f32 %v1142_v12, %v933_v34 }
 0x53d   :  { %953 = vst [vmem:[#allocation13 + $0x70] sm:$0xff] %v934_v30 }
 0x542   :  { %v936_v35 = vpop.f32.mrf.mxu2 }
 0x543   :  { %v937_v17 = vadd.f32 %v1142_v12, %v936_v35 }
 0x545   :  { %954 = vst [vmem:[#allocation13 + $0x78] sm:$0xff] %v937_v17 }
 0x546   :  { %967 = dma.vmem_to_hbm [thread:$0]  %s960_s5, 2048, %s962_s8, [#allocation4], %s1325_s21, %s1325_s21, %s1326_s22  }
 0x547   :  { %1319 = dma.done.wait [#allocation4], 2048  }
 0x548   :  { %1320 = vsyncadd [#allocation4], 4294965248 }
 0x549   :  { %972 = vsyncpa [#allocation3], 1 }
 0x54a   :  { %973 = vsyncpa [#allocation6], 1 }
 0x54b   :  { %974 = vsyncpa [#allocation9], 1 }
 0x54c   :  { %975 = vsyncpa [#allocation12], 1 }
 0x54d   :  { %976 = vsyncpa [#allocation4], 1 }

</bundles_post_ra>
